<compile_context>
chip_gen: v5e
topology: v5e:2x2
jax: 0.10.0
libtpu: 0.0.40
codegen_flags: <defaults>
</compile_context>

<pallas_src>
import functools

import jax
import jax.numpy as jnp
from jax import lax
from jax.experimental import pallas as pl
from jax.experimental.pallas import tpu as pltpu

_INV_SQRT2 = 0.7071067811865476  # hoisted constant for exact (erf) GELU
_MIB = 1024 * 1024


def _round_up(a: int, b: int) -> int:
    return (a + b - 1) // b * b


def _mlp_block_kernel(x_ref, g_ref, beta_ref, w1_ref, b1_ref, w2_ref, b2_ref,
                      o_ref, xn_ref, acc_ref, *, eps: float, approximate_gelu: bool):
    k = pl.program_id(1)

    # ---- LayerNorm once per row tile (k == 0); cache result in compute dtype ----
    @pl.when(k == 0)
    def _():
        # Single-pass stats: var = E[x^2] - E[x]^2 (halves XLU reduction passes),
        # gamma folded into the rsqrt scale (saves one VPU mul per element).
        x = x_ref[...].astype(jnp.float32)                      # (tr, E)
        mean = jnp.mean(x, axis=-1, keepdims=True)
        mean_sq = jnp.mean(x * x, axis=-1, keepdims=True)
        var = jnp.maximum(mean_sq - mean * mean, 0.0)
        scale = lax.rsqrt(var + eps) * g_ref[...].astype(jnp.float32)
        xn = (x - mean) * scale + beta_ref[...].astype(jnp.float32)
        xn_ref[...] = xn.astype(xn_ref.dtype)
        acc_ref[...] = jnp.zeros_like(acc_ref)

    # ---- Linear(E -> tm chunk of M): MXU in native dtype, f32 accumulate ----
    h = jnp.dot(xn_ref[...], w1_ref[...], preferred_element_type=jnp.float32)
    h = h + b1_ref[...].astype(jnp.float32)

    # ---- GELU ----
    if approximate_gelu:
        # tanh approximation: transcendental goes to the EUP slot (essentially
        # free once MXU-bound).  Slight deviation from nn.GELU()'s exact erf.
        h = jax.nn.gelu(h, approximate=True)
    else:
        # exact (erf) GELU: matches nn.GELU() default
        h = 0.5 * h * (1.0 + lax.erf(h * _INV_SQRT2))

    # Dropout(p=0.1): identity in eval mode.
    # TODO(synk): training-mode dropout would use pltpu.prng_seed / prng_random_bits.

    # ---- Linear(tm chunk of M -> E): accumulate over M chunks in f32 ----
    acc_ref[...] += jnp.dot(h.astype(w2_ref.dtype), w2_ref[...],
                            preferred_element_type=jnp.float32)

    @pl.when(k == pl.num_programs(1) - 1)
    def _():
        o_ref[...] = (acc_ref[...] + b2_ref[...].astype(jnp.float32)).astype(o_ref.dtype)


def _vmem_capacity_bytes(default: int = 128 * _MIB) -> int:
    """Trace-time query of per-core VMEM capacity; falls back to 128 MiB."""
    try:
        cap = getattr(pltpu.get_tpu_info(), "vmem_capacity_bytes", None)
        if cap:
            return int(cap)
    except Exception:
        pass
    return default


def _estimate_vmem(tr, tm, E, x_isz, w_isz, c_isz, w_bufs):
    """Approximate VMEM working set for a candidate (tr, tm) tiling."""
    weights = w_bufs * (E * tm + tm + tm * E) * w_isz      # W1 chunk + b1 chunk + W2 chunk
    consts = 3 * E * w_isz                                  # gamma, beta, b2 (Buffered(1))
    io = 2 * 2 * tr * E * x_isz                             # x + out tiles, double-buffered
    scratch = tr * E * (c_isz + 4)                          # xn cache + f32 accumulator
    interm = 2 * tr * tm * 4                                # (tr, tm) f32 h + GELU temps
    return weights + consts + io + scratch + interm


def mlp_block_forward(x, params, *, eps: float = 1e-5,
                      tile_rows: int | None = None, tile_m: int | None = None,
                      vmem_limit_bytes: int | None = None,
                      approximate_gelu: bool = False):
    """x: (batch, seq, embed_dim) -> (batch, seq, embed_dim).

    tile_rows / tile_m / vmem_limit_bytes default to None = auto-derive from the
    device's VMEM capacity.  Note: when mlp_dim must be chunked, LARGER tile_rows
    is better (arithmetic intensity on weight traffic scales with tile_rows);
    never shrink it below ~256 on any generation unless rows are small.
    """
    B, S, E = x.shape
    rows = B * S
    M = params["w1"].shape[1]
    compute_dtype = params["w1"].dtype

    x_isz = jnp.dtype(x.dtype).itemsize
    w_isz = jnp.dtype(compute_dtype).itemsize
    c_isz = w_isz

    sub32 = x_isz < 4 or w_isz < 4
    row_align = 16 if sub32 else 8
    rows_cap = _round_up(rows, row_align)

    # --- generation-aware VMEM budget ---
    vmem_cap = _vmem_capacity_bytes()
    small_vmem = vmem_cap <= 64 * _MIB            # v7x-class: 64 MiB/TC, 2 TCs/chip
    if vmem_limit_bytes is None:
        if small_vmem:
            vmem_limit_bytes = min(vmem_cap - 12 * _MIB, 52 * _MIB)
        else:                                     # v5e/v6e: 128 MiB physical
            vmem_limit_bytes = min(vmem_cap - 24 * _MIB, 104 * _MIB)
    budget = int(vmem_limit_bytes * 0.85)         # headroom for Mosaic internal scratch

    # --- tile selection ---
    row_cands = [2048, 1024, 512, 256, 128, 64, 32, 16, 8]   # 256-aligned at the top
    tr = tm = None
    if tile_rows is not None or tile_m is not None:
        tr = _round_up(max(row_align, min(tile_rows or 256, rows_cap)), row_align)
        tm_req = tile_m if tile_m is not None else M
        tm = M if tm_req >= M else _round_up(min(tm_req, M), 128)
    else:
        # 1) Prefer fully VMEM-resident weights (num_m == 1): DMA'd exactly once.
        for cand in row_cands:
            t = _round_up(min(cand, rows_cap), row_align)
            if _estimate_vmem(t, M, E, x_isz, w_isz, c_isz, w_bufs=1) <= budget:
                tr, tm = t, M
                break
        # 2) Otherwise chunk mlp_dim, keeping tr as large as possible.
        if tr is None:
            m_cands = [1024, 512, 256, 128]
            for cand in row_cands:
                t = _round_up(min(cand, rows_cap), row_align)
                found = False
                for mc in m_cands:
                    if mc >= M:
                        continue
                    if _estimate_vmem(t, mc, E, x_isz, w_isz, c_isz, w_bufs=3) <= budget:
                        tr, tm = t, mc
                        found = True
                        break
                if found:
                    break
        if tr is None:      # last resort: minimal tiles
            tr = row_align
            tm = M if M <= 128 else 128

    # On dual-TensorCore chips make sure the "parallel" rows axis has >= 2 tiles
    # whenever the row count permits, so both cores get work.
    if small_vmem and rows_cap > row_align:
        half = _round_up(max(row_align, (rows + 1) // 2), row_align)
        tr = min(tr, half)
    tr = _round_up(max(row_align, tr), row_align)

    rows_pad = _round_up(rows, tr)
    num_r = rows_pad // tr

    if tm >= M:
        tm = M
        M_pad = M
    else:
        tm = _round_up(tm, 128)
        M_pad = _round_up(M, tm)
    num_m = M_pad // tm

    # --- operand preparation (pad rows / mlp_dim to tile multiples) ---
    x2d = x.reshape(rows, E)
    if rows_pad != rows:
        x2d = jnp.pad(x2d, ((0, rows_pad - rows), (0, 0)))

    ln_g = params["ln_gamma"].reshape(1, E)
    ln_b = params["ln_beta"].reshape(1, E)
    w1 = params["w1"]                          # (E, M)
    b1 = params["b1"].reshape(1, M)
    w2 = params["w2"]                          # (M, E)
    b2 = params["b2"].reshape(1, E)
    if M_pad != M:
        w1 = jnp.pad(w1, ((0, 0), (0, M_pad - M)))
        b1 = jnp.pad(b1, ((0, 0), (0, M_pad - M)))
        w2 = jnp.pad(w2, ((0, M_pad - M), (0, 0)))

    # --- pipeline modes ---
    const_mode = pl.Buffered(1)                       # gamma / beta / b2: constant index
    if num_m == 1:
        w_mode = pl.Buffered(1)                       # resident weights: DMA'd once
    elif num_m >= 3:
        w_mode = pl.Buffered(3)                       # hide DMA jitter on the weight stream
    else:
        w_mode = None                                 # default double-buffering

    grid = (num_r, num_m)

    # --- cost estimate reflecting actual traffic ---
    weight_bytes = (w1.size * w1.dtype.itemsize
                    + b1.size * b1.dtype.itemsize
                    + w2.size * w2.dtype.itemsize)
    weight_bytes *= 1 if num_m == 1 else num_r        # re-streamed per row tile if chunked
    cost = pl.CostEstimate(
        flops=4 * rows_pad * E * M_pad,               # two matmuls
        transcendentals=rows_pad * M_pad,             # erf / tanh in GELU
        bytes_accessed=(2 * rows_pad * E * x_isz      # x in + out
                        + weight_bytes
                        + (ln_g.size + ln_b.size + b2.size) * w_isz),
    )

    out2d = pl.pallas_call(
        functools.partial(_mlp_block_kernel, eps=eps, approximate_gelu=approximate_gelu),
        out_shape=jax.ShapeDtypeStruct((rows_pad, E), x.dtype),
        grid_spec=pltpu.PrefetchScalarGridSpec(
            num_scalar_prefetch=0,
            grid=grid,
            in_specs=[
                pl.BlockSpec((tr, E), lambda i, k: (i, 0)),                            # x tile
                pl.BlockSpec((1, E), lambda i, k: (0, 0), pipeline_mode=const_mode),   # ln gamma
                pl.BlockSpec((1, E), lambda i, k: (0, 0), pipeline_mode=const_mode),   # ln beta
                pl.BlockSpec((E, tm), lambda i, k: (0, k), pipeline_mode=w_mode),      # W1 chunk
                pl.BlockSpec((1, tm), lambda i, k: (0, k), pipeline_mode=w_mode),      # b1 chunk
                pl.BlockSpec((tm, E), lambda i, k: (k, 0), pipeline_mode=w_mode),      # W2 chunk
                pl.BlockSpec((1, E), lambda i, k: (0, 0), pipeline_mode=const_mode),   # b2
            ],
            out_specs=pl.BlockSpec((tr, E), lambda i, k: (i, 0)),
            scratch_shapes=[
                pltpu.VMEM((tr, E), compute_dtype),   # cached LayerNorm output
                pltpu.VMEM((tr, E), jnp.float32),     # f32 accumulator for Linear2
            ],
        ),
        compiler_params=pltpu.CompilerParams(
            dimension_semantics=("parallel", "arbitrary"),
            vmem_limit_bytes=int(vmem_limit_bytes)),
        cost_estimate=cost,
    )(x2d, ln_g, ln_b, w1, b1, w2, b2)

    return out2d[:rows].reshape(B, S, E)


def init_params(key, embedding_dim, mlp_dim, dtype=jnp.float32):
    """Deterministic init mirroring nn.Linear / nn.LayerNorm shapes."""
    k1, k2, k3, k4 = jax.random.split(key, 4)
    lim1 = 1.0 / jnp.sqrt(embedding_dim)
    lim2 = 1.0 / jnp.sqrt(mlp_dim)
    return {
        "ln_gamma": jnp.ones((embedding_dim,), dtype),
        "ln_beta": jnp.zeros((embedding_dim,), dtype),
        # stored as (in_features, out_features) so kernel does x @ W + b
        "w1": jax.random.uniform(k1, (embedding_dim, mlp_dim), dtype, -lim1, lim1),
        "b1": jax.random.uniform(k2, (mlp_dim,), dtype, -lim1, lim1),
        "w2": jax.random.uniform(k3, (mlp_dim, embedding_dim), dtype, -lim2, lim2),
        "b2": jax.random.uniform(k4, (embedding_dim,), dtype, -lim2, lim2),
    }


def _reference(x, params, eps=1e-5):
    """Pure-JAX reference for correctness checking."""
    mean = jnp.mean(x, axis=-1, keepdims=True)
    var = jnp.mean((x - mean) ** 2, axis=-1, keepdims=True)
    xn = (x - mean) / jnp.sqrt(var + eps)
    xn = xn * params["ln_gamma"] + params["ln_beta"]
    h = xn @ params["w1"] + params["b1"]
    h = jax.nn.gelu(h, approximate=False)
    y = h @ params["w2"] + params["b2"]
    return y


if __name__ == "__main__":
    key = jax.random.PRNGKey(0)
    kx, kp = jax.random.split(key)

    batch, seq, embedding_dim, mlp_dim = 2, 8, 32, 64
    x = jax.random.normal(kx, (batch, seq, embedding_dim), jnp.float32)
    params = init_params(kp, embedding_dim, mlp_dim)

    out = mlp_block_forward(x, params)
    out = jax.block_until_ready(out)

    ref = _reference(x, params)
    assert out.shape == (batch, seq, embedding_dim)
    assert jnp.allclose(out, ref, atol=1e-4, rtol=1e-4), "mismatch vs reference"

    print("KERNEL_OK")
</pallas_src>

<mosaic_0001>
module attributes {stable_mosaic.version = 11 : i64} {
  func.func @_mlp_block_kernel(%arg0: i32, %arg1: i32, %arg2: memref<16x32xf32, #tpu.memory_space<vmem>>, %arg3: memref<1x32xf32, #tpu.memory_space<vmem>>, %arg4: memref<1x32xf32, #tpu.memory_space<vmem>>, %arg5: memref<32x64xf32, #tpu.memory_space<vmem>>, %arg6: memref<1x64xf32, #tpu.memory_space<vmem>>, %arg7: memref<64x32xf32, #tpu.memory_space<vmem>>, %arg8: memref<1x32xf32, #tpu.memory_space<vmem>>, %arg9: memref<16x32xf32, #tpu.memory_space<vmem>>, %arg10: memref<16x32xf32, #tpu.memory_space<vmem>>, %arg11: memref<16x32xf32, #tpu.memory_space<vmem>>) attributes {dimension_semantics = [#tpu.dimension_semantics<parallel>, #tpu.dimension_semantics<arbitrary>], iteration_bounds = array<i64: 1, 1>, scalar_prefetch = 0 : i64, scratch_operands = 2 : i64, tpu.core_type = #tpu.core_type<tc>, window_params = [{transform_indices = @transform_0, window_bounds = array<i64: 16, 32>}, {pipeline_mode = #tpu.pipeline_mode<synchronous>, transform_indices = @transform_1, window_bounds = array<i64: 1, 32>}, {pipeline_mode = #tpu.pipeline_mode<synchronous>, transform_indices = @transform_2, window_bounds = array<i64: 1, 32>}, {pipeline_mode = #tpu.pipeline_mode<synchronous>, transform_indices = @transform_3, window_bounds = array<i64: 32, 64>}, {pipeline_mode = #tpu.pipeline_mode<synchronous>, transform_indices = @transform_4, window_bounds = array<i64: 1, 64>}, {pipeline_mode = #tpu.pipeline_mode<synchronous>, transform_indices = @transform_5, window_bounds = array<i64: 64, 32>}, {pipeline_mode = #tpu.pipeline_mode<synchronous>, transform_indices = @transform_6, window_bounds = array<i64: 1, 32>}, {transform_indices = @transform_7, window_bounds = array<i64: 16, 32>}]} {
    %c0_i32 = arith.constant 0 : i32
    %0 = arith.cmpi eq, %arg1, %c0_i32 : i32
    %1 = arith.extui %0 : i1 to i32
    %c0_i32_0 = arith.constant 0 : i32
    %2 = arith.cmpi ne, %1, %c0_i32_0 : i32
    scf.if %2 {
      %c0_18 = arith.constant 0 : index
      %c0_19 = arith.constant 0 : index
      %25 = vector.load %arg2[%c0_18, %c0_19] : memref<16x32xf32, #tpu.memory_space<vmem>>, vector<16x32xf32>
      %cst_20 = arith.constant dense<0.000000e+00> : vector<16xf32>
      %26 = vector.multi_reduction <add>, %25, %cst_20 [1] : vector<16x32xf32> to vector<16xf32>
      %27 = vector.shape_cast %26 : vector<16xf32> to vector<16x1xf32>
      %cst_21 = arith.constant 3.200000e+01 : f32
      %28 = vector.broadcast %cst_21 : f32 to vector<16x1xf32>
      %29 = arith.divf %27, %28 : vector<16x1xf32>
      %30 = arith.mulf %25, %25 : vector<16x32xf32>
      %cst_22 = arith.constant dense<0.000000e+00> : vector<16xf32>
      %31 = vector.multi_reduction <add>, %30, %cst_22 [1] : vector<16x32xf32> to vector<16xf32>
      %32 = vector.shape_cast %31 : vector<16xf32> to vector<16x1xf32>
      %cst_23 = arith.constant 3.200000e+01 : f32
      %33 = vector.broadcast %cst_23 : f32 to vector<16x1xf32>
      %34 = arith.divf %32, %33 : vector<16x1xf32>
      %35 = arith.mulf %29, %29 : vector<16x1xf32>
      %36 = arith.subf %34, %35 : vector<16x1xf32>
      %cst_24 = arith.constant 0.000000e+00 : f32
      %37 = vector.broadcast %cst_24 : f32 to vector<16x1xf32>
      %38 = arith.maximumf %36, %37 : vector<16x1xf32>
      %cst_25 = arith.constant 9.99999974E-6 : f32
      %39 = vector.broadcast %cst_25 : f32 to vector<16x1xf32>
      %40 = arith.addf %38, %39 : vector<16x1xf32>
      %41 = math.rsqrt %40 : vector<16x1xf32>
      %c0_26 = arith.constant 0 : index
      %c0_27 = arith.constant 0 : index
      %42 = vector.load %arg3[%c0_26, %c0_27] : memref<1x32xf32, #tpu.memory_space<vmem>>, vector<1x32xf32>
      %43 = vector.broadcast %41 : vector<16x1xf32> to vector<16x32xf32>
      %44 = vector.broadcast %42 : vector<1x32xf32> to vector<16x32xf32>
      %45 = arith.mulf %43, %44 : vector<16x32xf32>
      %46 = vector.broadcast %29 : vector<16x1xf32> to vector<16x32xf32>
      %47 = arith.subf %25, %46 : vector<16x32xf32>
      %48 = arith.mulf %47, %45 : vector<16x32xf32>
      %c0_28 = arith.constant 0 : index
      %c0_29 = arith.constant 0 : index
      %49 = vector.load %arg4[%c0_28, %c0_29] : memref<1x32xf32, #tpu.memory_space<vmem>>, vector<1x32xf32>
      %50 = vector.broadcast %49 : vector<1x32xf32> to vector<16x32xf32>
      %51 = arith.addf %48, %50 : vector<16x32xf32>
      %c0_30 = arith.constant 0 : index
      %c0_31 = arith.constant 0 : index
      %52 = vector.load %arg10[%c0_30, %c0_31] : memref<16x32xf32, #tpu.memory_space<vmem>>, vector<16x32xf32>
      tpu.vector_store %arg10[%c0_30, %c0_31], %51 {strides = array<i32>} : memref<16x32xf32, #tpu.memory_space<vmem>>, vector<16x32xf32>,
      %cst_32 = arith.constant 0.000000e+00 : f32
      %53 = vector.broadcast %cst_32 : f32 to vector<16x32xf32>
      %c0_33 = arith.constant 0 : index
      %c0_34 = arith.constant 0 : index
      %54 = vector.load %arg11[%c0_33, %c0_34] : memref<16x32xf32, #tpu.memory_space<vmem>>, vector<16x32xf32>
      tpu.vector_store %arg11[%c0_33, %c0_34], %53 {strides = array<i32>} : memref<16x32xf32, #tpu.memory_space<vmem>>, vector<16x32xf32>,
    } else {
    }
    %c0 = arith.constant 0 : index
    %c0_1 = arith.constant 0 : index
    %3 = vector.load %arg10[%c0, %c0_1] : memref<16x32xf32, #tpu.memory_space<vmem>>, vector<16x32xf32>
    %c0_2 = arith.constant 0 : index
    %c0_3 = arith.constant 0 : index
    %4 = vector.load %arg5[%c0_2, %c0_3] : memref<32x64xf32, #tpu.memory_space<vmem>>, vector<32x64xf32>
    %cst = arith.constant dense<0.000000e+00> : vector<16x64xf32>
    %5 = tpu.matmul %3, %4, %cst {dimension_numbers = #tpu.dot_dimension_numbers<[1], [0], [0], [1], [0, 0, 1, 1], [], []>} : vector<16x32xf32>, vector<32x64xf32>, vector<16x64xf32> -> vector<16x64xf32>
    %c0_4 = arith.constant 0 : index
    %c0_5 = arith.constant 0 : index
    %6 = vector.load %arg6[%c0_4, %c0_5] : memref<1x64xf32, #tpu.memory_space<vmem>>, vector<1x64xf32>
    %7 = vector.broadcast %6 : vector<1x64xf32> to vector<16x64xf32>
    %8 = arith.addf %5, %7 : vector<16x64xf32>
    %cst_6 = arith.constant 5.000000e-01 : f32
    %9 = vector.broadcast %cst_6 : f32 to vector<16x64xf32>
    %10 = arith.mulf %9, %8 : vector<16x64xf32>
    %cst_7 = arith.constant 0.707106769 : f32
    %11 = vector.broadcast %cst_7 : f32 to vector<16x64xf32>
    %12 = arith.mulf %8, %11 : vector<16x64xf32>
    %13 = math.erf %12 : vector<16x64xf32>
    %cst_8 = arith.constant 1.000000e+00 : f32
    %14 = vector.broadcast %cst_8 : f32 to vector<16x64xf32>
    %15 = arith.addf %14, %13 : vector<16x64xf32>
    %16 = arith.mulf %10, %15 : vector<16x64xf32>
    %c0_9 = arith.constant 0 : index
    %c0_10 = arith.constant 0 : index
    %17 = vector.load %arg11[%c0_9, %c0_10] : memref<16x32xf32, #tpu.memory_space<vmem>>, vector<16x32xf32>
    %c0_11 = arith.constant 0 : index
    %c0_12 = arith.constant 0 : index
    %18 = vector.load %arg7[%c0_11, %c0_12] : memref<64x32xf32, #tpu.memory_space<vmem>>, vector<64x32xf32>
    %cst_13 = arith.constant dense<0.000000e+00> : vector<16x32xf32>
    %19 = tpu.matmul %16, %18, %cst_13 {dimension_numbers = #tpu.dot_dimension_numbers<[1], [0], [0], [1], [0, 0, 1, 1], [], []>} : vector<16x64xf32>, vector<64x32xf32>, vector<16x32xf32> -> vector<16x32xf32>
    %20 = arith.addf %17, %19 : vector<16x32xf32>
    %c0_14 = arith.constant 0 : index
    %c0_15 = arith.constant 0 : index
    %21 = vector.load %arg11[%c0_14, %c0_15] : memref<16x32xf32, #tpu.memory_space<vmem>>, vector<16x32xf32>
    tpu.vector_store %arg11[%c0_14, %c0_15], %20 {strides = array<i32>} : memref<16x32xf32, #tpu.memory_space<vmem>>, vector<16x32xf32>,
    %c0_i32_16 = arith.constant 0 : i32
    %22 = arith.cmpi eq, %arg1, %c0_i32_16 : i32
    %23 = arith.extui %22 : i1 to i32
    %c0_i32_17 = arith.constant 0 : i32
    %24 = arith.cmpi ne, %23, %c0_i32_17 : i32
    scf.if %24 {
      %c0_18 = arith.constant 0 : index
      %c0_19 = arith.constant 0 : index
      %25 = vector.load %arg11[%c0_18, %c0_19] : memref<16x32xf32, #tpu.memory_space<vmem>>, vector<16x32xf32>
      %c0_20 = arith.constant 0 : index
      %c0_21 = arith.constant 0 : index
      %26 = vector.load %arg8[%c0_20, %c0_21] : memref<1x32xf32, #tpu.memory_space<vmem>>, vector<1x32xf32>
      %27 = vector.broadcast %26 : vector<1x32xf32> to vector<16x32xf32>
      %28 = arith.addf %25, %27 : vector<16x32xf32>
      %c0_22 = arith.constant 0 : index
      %c0_23 = arith.constant 0 : index
      %29 = vector.load %arg9[%c0_22, %c0_23] : memref<16x32xf32, #tpu.memory_space<vmem>>, vector<16x32xf32>
      tpu.vector_store %arg9[%c0_22, %c0_23], %28 {strides = array<i32>} : memref<16x32xf32, #tpu.memory_space<vmem>>, vector<16x32xf32>,
    } else {
    }
    return
  }
  func.func @transform_0(%arg0: i32, %arg1: i32) -> (i32, i32) {
    %c0_i32 = arith.constant 0 : i32
    %c0_i32_0 = arith.constant 0 : i32
    return %arg0, %c0_i32 : i32, i32
  }
  func.func @transform_1(%arg0: i32, %arg1: i32) -> (i32, i32) {
    %c0_i32 = arith.constant 0 : i32
    %c0_i32_0 = arith.constant 0 : i32
    %c0_i32_1 = arith.constant 0 : i32
    return %c0_i32, %c0_i32_0 : i32, i32
  }
  func.func @transform_2(%arg0: i32, %arg1: i32) -> (i32, i32) {
    %c0_i32 = arith.constant 0 : i32
    %c0_i32_0 = arith.constant 0 : i32
    %c0_i32_1 = arith.constant 0 : i32
    return %c0_i32, %c0_i32_0 : i32, i32
  }
  func.func @transform_3(%arg0: i32, %arg1: i32) -> (i32, i32) {
    %c0_i32 = arith.constant 0 : i32
    %c0_i32_0 = arith.constant 0 : i32
    return %c0_i32, %arg1 : i32, i32
  }
  func.func @transform_4(%arg0: i32, %arg1: i32) -> (i32, i32) {
    %c0_i32 = arith.constant 0 : i32
    %c0_i32_0 = arith.constant 0 : i32
    return %c0_i32, %arg1 : i32, i32
  }
  func.func @transform_5(%arg0: i32, %arg1: i32) -> (i32, i32) {
    %c0_i32 = arith.constant 0 : i32
    %c0_i32_0 = arith.constant 0 : i32
    return %arg1, %c0_i32 : i32, i32
  }
  func.func @transform_6(%arg0: i32, %arg1: i32) -> (i32, i32) {
    %c0_i32 = arith.constant 0 : i32
    %c0_i32_0 = arith.constant 0 : i32
    %c0_i32_1 = arith.constant 0 : i32
    return %c0_i32, %c0_i32_0 : i32, i32
  }
  func.func @transform_7(%arg0: i32, %arg1: i32) -> (i32, i32) {
    %c0_i32 = arith.constant 0 : i32
    %c0_i32_0 = arith.constant 0 : i32
    return %arg0, %c0_i32 : i32, i32
  }
}

</mosaic_0001>

<bundles_post_ra>
// kernel: tpu_custom_call.1
= control target key start
LH: loop header
LB: loop body
LE: loop exit
PB: predicated region body
PF: predicated region fallthrough
CT: control target
= control target key end

     0   :  { %vm33_vm0 = vcmask 261120   ;;  %s543_s0 = inlined_call_operand.vmem [shape: f32[16,32], index: 0, kind: input, shape index: {}]   ;;  %s544_s1 = inlined_call_operand.vmem [shape: f32[1,32], index: 1, kind: input, shape index: {}]   ;;  %s545_s2 = inlined_call_operand.vmem [shape: f32[1,32], index: 2, kind: input, shape index: {}]   ;;  %s546_s3 = inlined_call_operand.vmem [shape: f32[32,64], index: 3, kind: input, shape index: {}]   ;;  %s547_s4 = inlined_call_operand.vmem [shape: f32[1,64], index: 4, kind: input, shape index: {}]   ;;  %s548_s5 = inlined_call_operand.vmem [shape: f32[64,32], index: 5, kind: input, shape index: {}]   ;;  %s549_s6 = inlined_call_operand.vmem [shape: f32[1,32], index: 6, kind: input, shape index: {}]   ;;  %s550_s7 = inlined_call_operand.hbm [shape: f32[16,32], index: 7, kind: output, shape index: {}]  }
   0x1   :  { %v421_v0 = vld [vmem:[%s543_s0 + $0x8] sm:$0xff]  ;;  %v426_v1 = vld [vmem:[%s543_s0] sm:$0xff] }
   0x2   :  { %v37_v2 = vsel %vm33_vm0, %v421_v0, 0.0  ;;  %v34_v3 = vsel %vm33_vm0, %v426_v1, 0.0 }
   0x3   :  { %38 = vadd.xlane.f32.xlu0 %v37_v2  ;;  %35 = vadd.xlane.f32.xlu1 %v34_v3 }
   0x4   :  { %12 = vsyncpa [#allocation5], 0  ;;  %v50_v4 = vmul.f32 %v421_v0, %v421_v0  ;;  %v49_v5 = vmul.f32 %v426_v1, %v426_v1  ;;  %v373_v8 = vmov 32.0   ;;  %v112_v25 = vld [vmem:[%s546_s3 + $0x18] sm:$0xff]  ;;  %v111_v26 = vld [vmem:[%s546_s3 + $0x10] sm:$0xff]  ;;  %s375_s30 = smov [#allocation4]  }
   0x5   :  { %337 = vrcp.f32 %v373_v8  ;;  %136 = vmatpush.msra.mxu0 %v112_v25  ;;  %316 = vmatpush.msra.mxu3 %v112_v25  ;;  %v110_v29 = vld [vmem:[%s546_s3 + $0x8] sm:$0xff]  ;;  %v109_v32 = vld [vmem:[%s546_s3] sm:$0xff]  ;;  %s296_s8 = sshll.u32 %s375_s30, 4  ;;  %s298_s11 = sshll.u32 %s550_s7, 4  ;;  %s297_s8 = int_to_ptr.vmem [resolvable:$true] %s296_s8  ;;  %s299_s11 = int_to_ptr.hbm [resolvable:$true] %s298_s11 }
   0x6   :  { %v54_v6 = vsel %vm33_vm0, %v50_v4, 0.0  ;;  %v51_v7 = vsel %vm33_vm0, %v49_v5, 0.0  ;;  %v333_v44 = vld [vmem:[%s544_s1] ss:$0 sm:$0xff]  ;;  %v244_v5 = vld [vmem:[%s548_s5 + $0x38] sm:$0xff]  ;;  %s377_s12 = smov 8  }
   0x7   :  { %137 = vmatpush.msra.mxu0 %v111_v26  ;;  %317 = vmatpush.msra.mxu3 %v111_v26  ;;  %v334_v50 = vld [vmem:[%s545_s2] ss:$0 sm:$0xff]  ;;  %v239_v26 = vld [vmem:[%s548_s5 + $0x10] sm:$0xff] }
   0x8   :  { %v335_v61 = vld [vmem:[%s547_s4] ss:$0 sm:$0xff]  ;;  %260 = vmatpush.msra.mxu1 %v244_v5  ;;  %320 = vmatpush.msra.mxu2 %v244_v5 }
   0x9   :  { %138 = vmatpush.msra.mxu0 %v110_v29  ;;  %318 = vmatpush.msra.mxu3 %v110_v29 }
   0xb   :  { %55 = vadd.xlane.f32.xlu0 %v54_v6  ;;  %52 = vadd.xlane.f32.xlu1 %v51_v7  ;;  %v338_v9 = vpop.eup %337 }
   0xc   :  { %v41_v10 = vmul.f32 32.0, %v338_v9  ;;  %vm45_vm1 = vweird.f32 %v338_v9  ;;  %139 = vmatpush.msra.mxu0 %v109_v32  ;;  %319 = vmatpush.msra.mxu3 %v109_v32  ;;  %v237_v32 = vld [vmem:[%s548_s5] sm:$0xff] }
   0xe   :  { %v42_v11 = vsub.f32 1.0, %v41_v10 }
  0x10   :  { %v43_v12 = vmul.f32 %v338_v9, %v42_v11 }
  0x12   :  { %v44_v13 = vadd.f32 %v338_v9, %v43_v12 }
  0x14   :  { %v46_v16 = vsel %vm45_vm1, %v338_v9, %v44_v13  ;;  %v243_v9 = vld [vmem:[%s548_s5 + $0x30] sm:$0xff]  ;;  %v242_v13 = vld [vmem:[%s548_s5 + $0x28] sm:$0xff]  ;;  %vm245_vm1 = vcmask 523264  }
  0x15   :  { %261 = vmatpush.msra.mxu1 %v243_v9  ;;  %321 = vmatpush.msra.mxu2 %v243_v9 }
  0x17   :  { %262 = vmatpush.msra.mxu1 %v242_v13  ;;  %322 = vmatpush.msra.mxu2 %v242_v13 }
  0x76   :  { %v39_v14 = vpop.xlane.xlu0 %38  ;;  %v36_v15 = vpop.xlane.xlu1 %35 }
  0x77   :  { %v47_v17 = vmul.f32 %v46_v16, %v36_v15  ;;  %v48_v18 = vmul.f32 %v46_v16, %v39_v14 }
  0x79   :  { %v59_v19 = vmul.f32 %v47_v17, %v47_v17  ;;  %v60_v22 = vmul.f32 %v48_v18, %v48_v18  ;;  %v94_v49 = vsub.f32 %v421_v0, %v48_v18  ;;  %v93_v53 = vsub.f32 %v426_v1, %v47_v17  ;;  %v241_v17 = vld [vmem:[%s548_s5 + $0x20] sm:$0xff] }
  0x7a   :  { %263 = vmatpush.msra.mxu1 %v241_v17  ;;  %323 = vmatpush.msra.mxu2 %v241_v17 }
  0x7e   :  { %v56_v20 = vpop.xlane.xlu0 %55  ;;  %v53_v21 = vpop.xlane.xlu1 %52 }
  0x7f   :  { %v58_v23 = vmul.f32 %v56_v20, %v46_v16  ;;  %v57_v24 = vmul.f32 %v53_v21, %v46_v16 }
  0x81   :  { %v62_v27 = vsub.f32 %v58_v23, %v60_v22  ;;  %v61_v28 = vsub.f32 %v57_v24, %v59_v19  ;;  %v240_v22 = vld [vmem:[%s548_s5 + $0x18] sm:$0xff] }
  0x82   :  { %264 = vmatpush.msra.mxu1 %v240_v22  ;;  %324 = vmatpush.msra.mxu2 %v240_v22 }
  0x83   :  { %v64_v30 = vmax.f32 %v62_v27, 0.0  ;;  %v63_v31 = vmax.f32 %v61_v28, 0.0 }
  0x84   :  { %265 = vmatpush.msra.mxu1 %v239_v26  ;;  %325 = vmatpush.msra.mxu2 %v239_v26 }
  0x85   :  { %v66_v33 = vadd.f32 1e-05, %v64_v30  ;;  %v65_v34 = vadd.f32 1e-05, %v63_v31  ;;  %v238_v31 = vld [vmem:[%s548_s5 + $0x8] sm:$0xff] }
  0x86   :  { %266 = vmatpush.msra.mxu1 %v238_v31  ;;  %326 = vmatpush.msra.mxu2 %v238_v31 }
  0x87   :  { %339 = vrsqrt.f32 %v66_v33  ;;  %vm73_vm3 = vweird.f32 %v65_v34  ;;  %vm83_vm5 = vweird.f32 %v66_v33 }
  0x88   :  { %341 = vrsqrt.f32 %v65_v34  ;;  %267 = vmatpush.msra.mxu1 %v237_v32  ;;  %327 = vmatpush.msra.mxu2 %v237_v32 }
  0x8d   :  { %v340_v35 = vpop.eup %339 }
  0x8e   :  { %v342_v36 = vpop.eup %341  ;;  %v78_v37 = vmul.f32 %v340_v35, %v66_v33  ;;  %vm84_vm2 = vweird.f32 %v340_v35 }
  0x8f   :  { %v68_v38 = vmul.f32 %v342_v36, %v65_v34  ;;  %vm74_vm4 = vweird.f32 %v342_v36  ;;  %vm85_vm6 = vmor %vm83_vm5, %vm84_vm2 }
  0x90   :  { %v79_v39 = vmul.f32 %v340_v35, %v78_v37  ;;  %vm75_vm7 = vmor %vm73_vm3, %vm74_vm4 }
  0x91   :  { %v69_v40 = vmul.f32 %v342_v36, %v68_v38 }
  0x92   :  { %v80_v41 = vmul.f32 0.5, %v79_v39 }
  0x93   :  { %v70_v42 = vmul.f32 0.5, %v69_v40 }
  0x94   :  { %v81_v43 = vsub.f32 1.5, %v80_v41 }
  0x95   :  { %v71_v45 = vsub.f32 1.5, %v70_v42 }
  0x96   :  { %v82_v46 = vmul.f32 %v340_v35, %v81_v43 }
  0x97   :  { %v72_v47 = vmul.f32 %v342_v36, %v71_v45 }
  0x98   :  { %v86_v48 = vsel %vm85_vm6, %v340_v35, %v82_v46 }
  0x99   :  { %v92_v51 = vmul.f32 %v333_v44, %v86_v48  ;;  %v76_v52 = vsel %vm75_vm7, %v342_v36, %v72_v47  ;;  %v374_v47 = vmov 0.0  }
  0x9a   :  { %v91_v54 = vmul.f32 %v333_v44, %v76_v52  ;;  %105 = vst.msk [vmem:[#allocation3] sm:$0xff] %vm33_vm0, %v374_v47 }
  0x9b   :  { %v96_v55 = vmul.f32 %v94_v49, %v92_v51  ;;  %106 = vst.msk [vmem:[#allocation3 + $0x8] sm:$0xff] %vm33_vm0, %v374_v47 }
  0x9c   :  { %v95_v56 = vmul.f32 %v93_v53, %v91_v54 }
  0x9d   :  { %v102_v57 = vadd.f32 %v334_v50, %v96_v55 }
  0x9e   :  { %v101_v58 = vadd.f32 %v334_v50, %v95_v56 }
  0x9f   :  { %104 = vst.msk [vmem:[#allocation2 + $0x8] sm:$0xff] %vm33_vm0, %v102_v57 }
  0xa0   :  { %103 = vst.msk [vmem:[#allocation2] sm:$0xff] %vm33_vm0, %v101_v58 }
  0xa6   :  { %v108_v59 = vld [vmem:[#allocation2 + $0x8] sm:$0xff] }
  0xa7   :  { %v107_v60 = vld [vmem:[#allocation2] sm:$0xff]  ;;  %311 = vmatmul.msk.f32.vlgmr.msra.gmra.mxu3 %vm33_vm0, %v108_v59 }
  0xa8   :  { %310 = vmatmul.msk.f32.vlgmr.msra.gmra.mxu0 %vm33_vm0, %v107_v60 }
 0x125   :  { %v141_v62 = vpop.f32.mrf.mxu0 }
 0x126   :  { %v465_v63 = vadd.f32 %v335_v61, %v141_v62 }
 0x128   :  { %v468_v0 = vmul.f32 0.70710677, %v465_v63 }
 0x12a   :  { %v151_v1 = vmul.f32 %v468_v0, %v468_v0  ;;  %v144_v2 = vpop.f32.mrf.mxu3 }
 0x12b   :  { %v472_v3 = vadd.f32 %v335_v61, %v144_v2 }
 0x12c   :  { %v474_v4 = vmin.f32 %v151_v1, 16.0 }
 0x12d   :  { %v480_v6 = vmul.f32 0.70710677, %v472_v3 }
 0x12e   :  { %v153_v7 = vmul.f32 2.1237322e-06, %v474_v4  ;;  %v164_v8 = vmul.f32 3.8918573e-05, %v474_v4 }
 0x12f   :  { %v191_v10 = vmul.f32 %v480_v6, %v480_v6 }
 0x130   :  { %v154_v11 = vadd.f32 0.00028619796, %v153_v7  ;;  %v165_v12 = vadd.f32 0.001143296, %v164_v8 }
 0x131   :  { %v492_v14 = vmin.f32 %v191_v10, 16.0 }
 0x132   :  { %v155_v15 = vmul.f32 %v154_v11, %v474_v4  ;;  %v166_v16 = vmul.f32 %v165_v12, %v474_v4 }
 0x133   :  { %v193_v18 = vmul.f32 2.1237322e-06, %v492_v14  ;;  %v204_v19 = vmul.f32 3.8918573e-05, %v492_v14 }
 0x134   :  { %v156_v20 = vadd.f32 0.0036580483, %v155_v15  ;;  %v167_v21 = vadd.f32 0.014752088, %v166_v16 }
 0x135   :  { %v194_v23 = vadd.f32 0.00028619796, %v193_v18  ;;  %v205_v24 = vadd.f32 0.001143296, %v204_v19  ;;  %v147_v19 = vmul.f32 0.5, %v465_v63 }
 0x136   :  { %v168_v25 = vmul.f32 %v167_v21, %v474_v4  ;;  %v157_v29 = vmul.f32 %v156_v20, %v474_v4  ;;  %v336_v63 = vld [vmem:[%s549_s6] ss:$0 sm:$0xff]  ;;  %s376_s6 = smov 128  }
 0x137   :  { %v195_v27 = vmul.f32 %v194_v23, %v492_v14  ;;  %v206_v28 = vmul.f32 %v205_v24, %v492_v14 }
 0x138   :  { %v169_v30 = vadd.f32 0.112945676, %v168_v25  ;;  %v158_v37 = vadd.f32 0.05243302, %v157_v29  ;;  %v148_v25 = vmul.f32 0.5, %v472_v3 }
 0x139   :  { %v196_v33 = vadd.f32 0.0036580483, %v195_v27  ;;  %v207_v34 = vadd.f32 0.014752088, %v206_v28  ;;  %v235_v28 = vld [vmem:[#allocation3] sm:$0xff] }
 0x13a   :  { %v170_v35 = vmul.f32 %v169_v30, %v474_v4  ;;  %v159_v43 = vmul.f32 %v158_v37, %v474_v4 }
 0x13b   :  { %v208_v36 = vmul.f32 %v207_v34, %v492_v14  ;;  %v197_v39 = vmul.f32 %v196_v33, %v492_v14 }
 0x13c   :  { %v171_v38 = vadd.f32 0.4994258, %v170_v35  ;;  %v160_v49 = vadd.f32 0.18741608, %v159_v43 }
 0x13d   :  { %v209_v40 = vadd.f32 0.112945676, %v208_v36  ;;  %v198_v45 = vadd.f32 0.05243302, %v197_v39 }
 0x13e   :  { %v172_v41 = vmul.f32 %v171_v38, %v474_v4  ;;  %v161_v53 = vmul.f32 %v160_v49, %v474_v4 }
 0x13f   :  { %v210_v42 = vmul.f32 %v209_v40, %v492_v14  ;;  %v199_v50 = vmul.f32 %v198_v45, %v492_v14 }
 0x140   :  { %v173_v44 = vadd.f32 1.0, %v172_v41  ;;  %v162_v57 = vadd.f32 1.1283791, %v161_v53 }
 0x141   :  { %v211_v46 = vadd.f32 0.4994258, %v210_v42  ;;  %v200_v55 = vadd.f32 0.18741608, %v199_v50 }
 0x142   :  { %343 = vrcp.f32 %v173_v44  ;;  %v185_v58 = vand.u32 2147483648, %v173_v44  ;;  %v183_v61 = vand.u32 2147483647, %v173_v44  ;;  %vm179_vm9 = vweird.f32 %v173_v44 }
 0x143   :  { %v212_v48 = vmul.f32 %v211_v46, %v492_v14  ;;  %v201_v62 = vmul.f32 %v200_v55, %v492_v14  ;;  %v163_v5 = vmul.f32 %v162_v57, %v468_v0 }
 0x144   :  { %v186_v7 = vor.u32 1.1754944e-38, %v185_v58  ;;  %vm184_vm11 = vcmp.eq.f32.partialorder %v183_v61, 8.507059e+37 }
 0x145   :  { %v213_v51 = vadd.f32 1.0, %v212_v48  ;;  %v202_v9 = vadd.f32 1.1283791, %v201_v62 }
 0x147   :  { %345 = vrcp.f32 %v213_v51  ;;  %v225_v10 = vand.u32 2147483648, %v213_v51  ;;  %v223_v13 = vand.u32 2147483647, %v213_v51  ;;  %vm219_vm13 = vweird.f32 %v213_v51 }
 0x148   :  { %v344_v52 = vpop.eup %343  ;;  %v203_v18 = vmul.f32 %v202_v9, %v480_v6  ;;  %v236_v6 = vld [vmem:[#allocation3 + $0x8] sm:$0xff] }
 0x149   :  { %v175_v54 = vmul.f32 %v344_v52, %v173_v44  ;;  %vm180_vm8 = vweird.f32 %v344_v52  ;;  %v226_v14 = vor.u32 1.1754944e-38, %v225_v10  ;;  %vm224_vm15 = vcmp.eq.f32.partialorder %v223_v13, 8.507059e+37 }
 0x14a   :  { %vm181_vm10 = vmor %vm179_vm9, %vm180_vm8 }
 0x14b   :  { %v176_v56 = vsub.f32 1.0, %v175_v54 }
 0x14d   :  { %v346_v59 = vpop.eup %345  ;;  %v177_v60 = vmul.f32 %v344_v52, %v176_v56 }
 0x14e   :  { %v215_v1 = vmul.f32 %v346_v59, %v213_v51  ;;  %vm220_vm12 = vweird.f32 %v346_v59 }
 0x14f   :  { %v178_v2 = vadd.f32 %v344_v52, %v177_v60  ;;  %vm221_vm14 = vmor %vm219_vm13, %vm220_vm12 }
 0x150   :  { %v216_v8 = vsub.f32 1.0, %v215_v1 }
 0x151   :  { %v182_v4 = vsel %vm181_vm10, %v344_v52, %v178_v2 }
 0x152   :  { %v187_v11 = vsel %vm184_vm11, %v186_v7, %v182_v4  ;;  %v217_v12 = vmul.f32 %v346_v59, %v216_v8 }
 0x153   :  { %v188_v15 = vmul.f32 %v187_v11, %v163_v5 }
 0x154   :  { %v218_v16 = vadd.f32 %v346_v59, %v217_v12 }
 0x155   :  { %v312_v17 = vclamps-f32 %v188_v15, 1.0 }
 0x156   :  { %v222_v0 = vsel %vm221_vm14, %v346_v59, %v218_v16 }
 0x157   :  { %v227_v20 = vsel %vm224_vm15, %v226_v14, %v222_v0  ;;  %v231_v21 = vadd.f32 1.0, %v312_v17 }
 0x158   :  { %v228_v22 = vmul.f32 %v227_v20, %v203_v18 }
 0x159   :  { %v233_v23 = vmul.f32 %v231_v21, %v147_v19 }
 0x15a   :  { %v313_v24 = vclamps-f32 %v228_v22, 1.0 }
 0x15b   :  { %314 = vmatmul.msk.f32.vlgmr.msra.gmra.mxu1 %vm245_vm1, %v233_v23 }
 0x15c   :  { %v232_v26 = vadd.f32 1.0, %v313_v24 }
 0x15e   :  { %v234_v27 = vmul.f32 %v232_v26, %v148_v25 }
 0x160   :  { %315 = vmatmul.msk.f32.vlgmr.msra.gmra.mxu2 %vm245_vm1, %v234_v27 }
 0x1d8   :  { %v269_v29 = vpop.f32.mrf.mxu1 }
 0x1d9   :  { %v275_v30 = vadd.f32 %v269_v29, %v235_v28 }
 0x1db   :  { %277 = vst.msk [vmem:[#allocation3] sm:$0xff] %vm33_vm0, %v275_v30 }
 0x1e2   :  { %v282_v31 = vld [vmem:[#allocation3] sm:$0xff] }
 0x1e3   :  { %v272_v32 = vpop.f32.mrf.mxu2  ;;  %v288_v33 = vadd.f32 %v336_v63, %v282_v31 }
 0x1e4   :  { %v276_v34 = vadd.f32 %v272_v32, %v236_v6 }
 0x1e5   :  { %290 = vst.msk [vmem:[#allocation4] sm:$0xff] %vm33_vm0, %v288_v33 }
 0x1e6   :  { %278 = vst.msk [vmem:[#allocation3 + $0x8] sm:$0xff] %vm33_vm0, %v276_v34 }
 0x1ed   :  { %v283_v3 = vld [vmem:[#allocation3 + $0x8] sm:$0xff] }
 0x1ee   :  { %v289_v35 = vadd.f32 %v336_v63, %v283_v3 }
 0x1f0   :  { %291 = vst.msk [vmem:[#allocation4 + $0x8] sm:$0xff] %vm33_vm0, %v289_v35 }
 0x1f1   :  { %304 = dma.vmem_to_hbm [thread:$0]  %s297_s8, 256, %s299_s11, [#allocation5], %s376_s6, %s376_s6, %s377_s12  }
 0x1f2   :  { %371 = dma.done.wait [#allocation5], 256  }
 0x1f3   :  { %372 = vsyncadd [#allocation5], 4294967040 }
 0x1f4   :  { %309 = vsyncpa [#allocation5], 1 }

</bundles_post_ra>
